<compile_context>
chip_gen: v5e
topology: v5e:2x2
jax: 0.10.0
libtpu: 0.0.40
codegen_flags: <defaults>
</compile_context>

<pallas_src>
from functools import partial

import jax
import jax.numpy as jnp
import numpy as np
from jax.experimental import pallas as pl
from jax.experimental.pallas import tpu as pltpu


def get_same_pad(k, s, d):
    assert not (s > 1 and d > 1)
    if s > 1:
        return (k - s + 1) // 2
    return (k - 1) * d // 2


def _factconv_kernel(x_ref, w1k0_ref, w1k1_ref, b1_ref,
                     w2k0_ref, w2k1_ref, b2_ref, h_ref, *scratch,
                     dilation, pad2):
    d = dilation
    x = x_ref[...]                      # (Cin, Lp) f32, L on the lane axis
    Lp = x.shape[1]
    L1 = Lp - d                         # kernel size == 2

    # ---- f1: Conv1d(Cin -> Cb, k=2, dilation=d) ----
    # Tiny channel counts -> contract over Cin on the VPU (broadcast FMAs +
    # sublane reduce); keeps every intermediate lane-dense and fully f32.
    xa = x[:, :L1]                      # tap 0
    xb = x[:, d:d + L1]                 # tap 1
    w1k0 = w1k0_ref[...]                # (Cb, Cin)
    w1k1 = w1k1_ref[...]
    h1 = (w1k0[:, :, None] * xa[None, :, :]
          + w1k1[:, :, None] * xb[None, :, :]).sum(axis=1) + b1_ref[...]
    # h1: (Cb, L1)

    # ---- f2: Conv1d(Cb -> Cout, k=2, dilation=d), zero-padded by pad2 ----
    if pad2 > 0:
        # TODO(synk): pad2>0 (dilation>1) path matches module semantics but is
        # not exercised by the self-test below; validate vs reference before
        # relying on it in production.
        h1p_ref = scratch[0]            # (Cb, L1 + 2*pad2) VMEM scratch
        h1p_ref[...] = jnp.zeros(h1p_ref.shape, jnp.float32)
        h1p_ref[:, pad2:pad2 + L1] = h1
        h1p = h1p_ref[...]
    else:
        h1p = h1
    L2 = h1p.shape[1] - d
    ha = h1p[:, :L2]
    hb = h1p[:, d:d + L2]
    w2k0 = w2k0_ref[...]                # (Cout, Cb)
    w2k1 = w2k1_ref[...]
    h2 = (w2k0[:, :, None] * ha[None, :, :]
          + w2k1[:, :, None] * hb[None, :, :]).sum(axis=1) + b2_ref[...]
    h_ref[...] = h2                     # (Cout, L2) lane-dense store


def _semi_orth_kernel(m_ref, o_ref, *, dk):
    # || W1_flat^T W1_flat - I ||_F^2 = sum(P*P) - 2*sum(M*M) + d
    m = m_ref[...]                                     # (Cb, Cin*K)
    p = jax.lax.dot_general(m, m, (((0,), (0,)), ((), ())),
                            preferred_element_type=jnp.float32,
                            precision=jax.lax.Precision.HIGHEST)
    o_ref[...] = (jnp.sum(p * p, keepdims=True)
                  - 2.0 * jnp.sum(m * m, keepdims=True) + dk)


def factorized_conv(x, w1, b1, w2, b2, *, kernel=2, dilation=1):
    """x: (N, Cin, L) NCW float32. Returns (h: (N, Cout, L), o: scalar)."""
    assert kernel == 2, "factorized conv kernel implemented for kernel=2"
    pad = get_same_pad(kernel, 1, dilation)
    pad1 = pad if dilation % 2 == 0 else pad + 1
    pad2 = pad

    N, Cin, L = x.shape
    Cb = w1.shape[0]
    Cout = w2.shape[0]

    # Only glue in the wrapper: zero-pad x along L (layout stays NCW).
    xpad = jnp.pad(x.astype(jnp.float32), ((0, 0), (0, 0), (pad1, pad1)))
    Lp = L + 2 * pad1
    L1 = Lp - dilation
    L2 = L1 + 2 * pad2 - dilation

    w1k0, w1k1 = w1[:, :, 0], w1[:, :, 1]              # (Cb, Cin)
    w2k0, w2k1 = w2[:, :, 0], w2[:, :, 1]              # (Cout, Cb)

    in_specs = [
        pl.BlockSpec((None, Cin, Lp), lambda n: (n, 0, 0)),   # one batch / step
        pl.BlockSpec((Cb, Cin), lambda n: (0, 0)),
        pl.BlockSpec((Cb, Cin), lambda n: (0, 0)),
        pl.BlockSpec((Cb, 1), lambda n: (0, 0)),
        pl.BlockSpec((Cout, Cb), lambda n: (0, 0)),
        pl.BlockSpec((Cout, Cb), lambda n: (0, 0)),
        pl.BlockSpec((Cout, 1), lambda n: (0, 0)),
    ]
    out_specs = pl.BlockSpec((None, Cout, L2), lambda n: (n, 0, 0))
    scratch = ([pltpu.VMEM((Cb, L1 + 2 * pad2), jnp.float32)]
               if pad2 > 0 else [])

    h = pl.pallas_call(
        partial(_factconv_kernel, dilation=dilation, pad2=pad2),
        grid=(N,),
        in_specs=in_specs,
        out_specs=out_specs,
        out_shape=jax.ShapeDtypeStruct((N, Cout, L2), jnp.float32),
        scratch_shapes=scratch,
        compiler_params=pltpu.CompilerParams(
            dimension_semantics=("parallel",),
            vmem_limit_bytes=32 * 1024 * 1024),
    )(xpad, w1k0, w1k1, b1.reshape(Cb, 1), w2k0, w2k1, b2.reshape(Cout, 1))

    # Semi-orthogonality objective: depends only on w1, so run it once in its
    # own tiny kernel rather than per grid step.
    w1flat = w1.reshape(Cb, Cin * kernel).astype(jnp.float32)
    o = pl.pallas_call(
        partial(_semi_orth_kernel, dk=float(Cin * kernel)),
        out_shape=jax.ShapeDtypeStruct((1, 1), jnp.float32),
        in_specs=[pl.BlockSpec(memory_space=pltpu.MemorySpace.VMEM)],
        out_specs=pl.BlockSpec(memory_space=pltpu.MemorySpace.VMEM),
    )(w1flat)

    return h, o[0, 0]


def _reference(x, w1, b1, w2, b2, *, dilation, pad1, pad2):
    dn = ('NCH', 'OIH', 'NCH')
    prec = jax.lax.Precision.HIGHEST
    h1 = jax.lax.conv_general_dilated(x, w1, (1,), [(pad1, pad1)],
                                      rhs_dilation=(dilation,),
                                      dimension_numbers=dn,
                                      precision=prec) + b1[None, :, None]
    h2 = jax.lax.conv_general_dilated(h1, w2, (1,), [(pad2, pad2)],
                                      rhs_dilation=(dilation,),
                                      dimension_numbers=dn,
                                      precision=prec) + b2[None, :, None]
    m = w1.reshape(w1.shape[0], -1).T
    p = jnp.dot(m, m.T, precision=prec)
    q = p - jnp.eye(p.shape[0], dtype=jnp.float32)
    return h2, jnp.trace(jnp.dot(q, q.T, precision=prec))


if __name__ == "__main__":
    in_c, d_bneck, out_c = 4, 6, 8
    kernel, dilation = 2, 1
    N, L = 2, 16

    key = jax.random.PRNGKey(0)
    k1, k2, k3, k4, k5 = jax.random.split(key, 5)
    fan1 = in_c * kernel
    fan2 = d_bneck * kernel
    # Deterministic init (uniform, scaled by 1/sqrt(fan_in), conv-style).
    w1 = jax.random.uniform(k1, (d_bneck, in_c, kernel), jnp.float32, -1, 1) / jnp.sqrt(fan1)
    b1 = jax.random.uniform(k2, (d_bneck,), jnp.float32, -1, 1) / jnp.sqrt(fan1)
    w2 = jax.random.uniform(k3, (out_c, d_bneck, kernel), jnp.float32, -1, 1) / jnp.sqrt(fan2)
    b2 = jax.random.uniform(k4, (out_c,), jnp.float32, -1, 1) / jnp.sqrt(fan2)
    x = jax.random.normal(k5, (N, in_c, L), jnp.float32)

    h, o = factorized_conv(x, w1, b1, w2, b2, kernel=kernel, dilation=dilation)
    h = jax.block_until_ready(h)
    o = jax.block_until_ready(o)

    pad = get_same_pad(kernel, 1, dilation)
    pad1 = pad if dilation % 2 == 0 else pad + 1
    h_ref, o_ref = _reference(x, w1, b1, w2, b2,
                              dilation=dilation, pad1=pad1, pad2=pad)
    assert h.shape == (N, out_c, L), h.shape
    np.testing.assert_allclose(np.asarray(h), np.asarray(h_ref), rtol=2e-3, atol=2e-3)
    np.testing.assert_allclose(np.asarray(o), np.asarray(o_ref), rtol=2e-3, atol=2e-3)
    print("KERNEL_OK")
</pallas_src>

<mosaic_0001>
module attributes {stable_mosaic.version = 11 : i64} {
  func.func @_factconv_kernel(%arg0: i32, %arg1: memref<1x4x18xf32, #tpu.memory_space<vmem>>, %arg2: memref<6x4xf32, #tpu.memory_space<vmem>>, %arg3: memref<6x4xf32, #tpu.memory_space<vmem>>, %arg4: memref<6x1xf32, #tpu.memory_space<vmem>>, %arg5: memref<8x6xf32, #tpu.memory_space<vmem>>, %arg6: memref<8x6xf32, #tpu.memory_space<vmem>>, %arg7: memref<8x1xf32, #tpu.memory_space<vmem>>, %arg8: memref<1x8x16xf32, #tpu.memory_space<vmem>>) attributes {dimension_semantics = [#tpu.dimension_semantics<parallel>], iteration_bounds = array<i64: 2>, scalar_prefetch = 0 : i64, scratch_operands = 0 : i64, tpu.core_type = #tpu.core_type<tc>, window_params = [{transform_indices = @transform_0, window_bounds = array<i64: 1, 4, 18>}, {pipeline_mode = #tpu.pipeline_mode<synchronous>, transform_indices = @transform_1, window_bounds = array<i64: 6, 4>}, {pipeline_mode = #tpu.pipeline_mode<synchronous>, transform_indices = @transform_2, window_bounds = array<i64: 6, 4>}, {pipeline_mode = #tpu.pipeline_mode<synchronous>, transform_indices = @transform_3, window_bounds = array<i64: 6, 1>}, {pipeline_mode = #tpu.pipeline_mode<synchronous>, transform_indices = @transform_4, window_bounds = array<i64: 8, 6>}, {pipeline_mode = #tpu.pipeline_mode<synchronous>, transform_indices = @transform_5, window_bounds = array<i64: 8, 6>}, {pipeline_mode = #tpu.pipeline_mode<synchronous>, transform_indices = @transform_6, window_bounds = array<i64: 8, 1>}, {transform_indices = @transform_7, window_bounds = array<i64: 1, 8, 16>}]} {
    %c0 = arith.constant 0 : index
    %c0_0 = arith.constant 0 : index
    %c0_1 = arith.constant 0 : index
    %0 = vector.load %arg1[%c0, %c0_0, %c0_1] : memref<1x4x18xf32, #tpu.memory_space<vmem>>, vector<1x4x18xf32>
    %1 = vector.shape_cast %0 : vector<1x4x18xf32> to vector<4x18xf32>
    %2 = vector.extract_strided_slice %1 {offsets = [0, 0], sizes = [4, 17], strides = [1, 1]} : vector<4x18xf32> to vector<4x17xf32>
    %3 = vector.extract_strided_slice %1 {offsets = [0, 1], sizes = [4, 17], strides = [1, 1]} : vector<4x18xf32> to vector<4x17xf32>
    %c0_2 = arith.constant 0 : index
    %c0_3 = arith.constant 0 : index
    %4 = vector.load %arg2[%c0_2, %c0_3] : memref<6x4xf32, #tpu.memory_space<vmem>>, vector<6x4xf32>
    %c0_4 = arith.constant 0 : index
    %c0_5 = arith.constant 0 : index
    %5 = vector.load %arg3[%c0_4, %c0_5] : memref<6x4xf32, #tpu.memory_space<vmem>>, vector<6x4xf32>
    %6 = vector.shape_cast %4 : vector<6x4xf32> to vector<6x4x1xf32>
    %7 = vector.shape_cast %2 : vector<4x17xf32> to vector<1x4x17xf32>
    %8 = vector.broadcast %6 : vector<6x4x1xf32> to vector<6x4x17xf32>
    %9 = vector.broadcast %7 : vector<1x4x17xf32> to vector<6x4x17xf32>
    %10 = arith.mulf %8, %9 : vector<6x4x17xf32>
    %11 = vector.shape_cast %5 : vector<6x4xf32> to vector<6x4x1xf32>
    %12 = vector.shape_cast %3 : vector<4x17xf32> to vector<1x4x17xf32>
    %13 = vector.broadcast %11 : vector<6x4x1xf32> to vector<6x4x17xf32>
    %14 = vector.broadcast %12 : vector<1x4x17xf32> to vector<6x4x17xf32>
    %15 = arith.mulf %13, %14 : vector<6x4x17xf32>
    %16 = arith.addf %10, %15 : vector<6x4x17xf32>
    %cst = arith.constant dense<0.000000e+00> : vector<6x17xf32>
    %17 = vector.multi_reduction <add>, %16, %cst [1] : vector<6x4x17xf32> to vector<6x17xf32>
    %c0_6 = arith.constant 0 : index
    %c0_7 = arith.constant 0 : index
    %18 = vector.load %arg4[%c0_6, %c0_7] : memref<6x1xf32, #tpu.memory_space<vmem>>, vector<6x1xf32>
    %19 = vector.broadcast %18 : vector<6x1xf32> to vector<6x17xf32>
    %20 = arith.addf %17, %19 : vector<6x17xf32>
    %21 = vector.extract_strided_slice %20 {offsets = [0, 0], sizes = [6, 16], strides = [1, 1]} : vector<6x17xf32> to vector<6x16xf32>
    %22 = vector.extract_strided_slice %20 {offsets = [0, 1], sizes = [6, 16], strides = [1, 1]} : vector<6x17xf32> to vector<6x16xf32>
    %c0_8 = arith.constant 0 : index
    %c0_9 = arith.constant 0 : index
    %23 = vector.load %arg5[%c0_8, %c0_9] : memref<8x6xf32, #tpu.memory_space<vmem>>, vector<8x6xf32>
    %c0_10 = arith.constant 0 : index
    %c0_11 = arith.constant 0 : index
    %24 = vector.load %arg6[%c0_10, %c0_11] : memref<8x6xf32, #tpu.memory_space<vmem>>, vector<8x6xf32>
    %25 = vector.shape_cast %23 : vector<8x6xf32> to vector<8x6x1xf32>
    %26 = vector.shape_cast %21 : vector<6x16xf32> to vector<1x6x16xf32>
    %27 = vector.broadcast %25 : vector<8x6x1xf32> to vector<8x6x16xf32>
    %28 = vector.broadcast %26 : vector<1x6x16xf32> to vector<8x6x16xf32>
    %29 = arith.mulf %27, %28 : vector<8x6x16xf32>
    %30 = vector.shape_cast %24 : vector<8x6xf32> to vector<8x6x1xf32>
    %31 = vector.shape_cast %22 : vector<6x16xf32> to vector<1x6x16xf32>
    %32 = vector.broadcast %30 : vector<8x6x1xf32> to vector<8x6x16xf32>
    %33 = vector.broadcast %31 : vector<1x6x16xf32> to vector<8x6x16xf32>
    %34 = arith.mulf %32, %33 : vector<8x6x16xf32>
    %35 = arith.addf %29, %34 : vector<8x6x16xf32>
    %cst_12 = arith.constant dense<0.000000e+00> : vector<8x16xf32>
    %36 = vector.multi_reduction <add>, %35, %cst_12 [1] : vector<8x6x16xf32> to vector<8x16xf32>
    %c0_13 = arith.constant 0 : index
    %c0_14 = arith.constant 0 : index
    %37 = vector.load %arg7[%c0_13, %c0_14] : memref<8x1xf32, #tpu.memory_space<vmem>>, vector<8x1xf32>
    %38 = vector.broadcast %37 : vector<8x1xf32> to vector<8x16xf32>
    %39 = arith.addf %36, %38 : vector<8x16xf32>
    %c0_15 = arith.constant 0 : index
    %c0_16 = arith.constant 0 : index
    %c0_17 = arith.constant 0 : index
    %40 = vector.load %arg8[%c0_15, %c0_16, %c0_17] : memref<1x8x16xf32, #tpu.memory_space<vmem>>, vector<1x8x16xf32>
    %41 = vector.shape_cast %40 : vector<1x8x16xf32> to vector<8x16xf32>
    %42 = vector.shape_cast %39 : vector<8x16xf32> to vector<1x8x16xf32>
    tpu.vector_store %arg8[%c0_15, %c0_16, %c0_17], %42 {strides = array<i32>} : memref<1x8x16xf32, #tpu.memory_space<vmem>>, vector<1x8x16xf32>,
    return
  }
  func.func @transform_0(%arg0: i32) -> (i32, i32, i32) {
    %c0_i32 = arith.constant 0 : i32
    %c0_i32_0 = arith.constant 0 : i32
    %c0_i32_1 = arith.constant 0 : i32
    return %arg0, %c0_i32, %c0_i32_0 : i32, i32, i32
  }
  func.func @transform_1(%arg0: i32) -> (i32, i32) {
    %c0_i32 = arith.constant 0 : i32
    %c0_i32_0 = arith.constant 0 : i32
    %c0_i32_1 = arith.constant 0 : i32
    return %c0_i32, %c0_i32_0 : i32, i32
  }
  func.func @transform_2(%arg0: i32) -> (i32, i32) {
    %c0_i32 = arith.constant 0 : i32
    %c0_i32_0 = arith.constant 0 : i32
    %c0_i32_1 = arith.constant 0 : i32
    return %c0_i32, %c0_i32_0 : i32, i32
  }
  func.func @transform_3(%arg0: i32) -> (i32, i32) {
    %c0_i32 = arith.constant 0 : i32
    %c0_i32_0 = arith.constant 0 : i32
    %c0_i32_1 = arith.constant 0 : i32
    return %c0_i32, %c0_i32_0 : i32, i32
  }
  func.func @transform_4(%arg0: i32) -> (i32, i32) {
    %c0_i32 = arith.constant 0 : i32
    %c0_i32_0 = arith.constant 0 : i32
    %c0_i32_1 = arith.constant 0 : i32
    return %c0_i32, %c0_i32_0 : i32, i32
  }
  func.func @transform_5(%arg0: i32) -> (i32, i32) {
    %c0_i32 = arith.constant 0 : i32
    %c0_i32_0 = arith.constant 0 : i32
    %c0_i32_1 = arith.constant 0 : i32
    return %c0_i32, %c0_i32_0 : i32, i32
  }
  func.func @transform_6(%arg0: i32) -> (i32, i32) {
    %c0_i32 = arith.constant 0 : i32
    %c0_i32_0 = arith.constant 0 : i32
    %c0_i32_1 = arith.constant 0 : i32
    return %c0_i32, %c0_i32_0 : i32, i32
  }
  func.func @transform_7(%arg0: i32) -> (i32, i32, i32) {
    %c0_i32 = arith.constant 0 : i32
    %c0_i32_0 = arith.constant 0 : i32
    %c0_i32_1 = arith.constant 0 : i32
    return %arg0, %c0_i32, %c0_i32_0 : i32, i32, i32
  }
}

</mosaic_0001>

<bundles_post_ra>
// kernel: tpu_custom_call.1
= control target key start
LH: loop header
LB: loop body
LE: loop exit
PB: predicated region body
PF: predicated region fallthrough
CT: control target
= control target key end

     0   :  { %12 = vsyncpa [#allocation3], 0  ;;  %s1159_s0 = inlined_call_operand.vmem [shape: f32[2,4,18], index: 0, kind: input, shape index: {}]   ;;  %s1160_s1 = inlined_call_operand.vmem [shape: f32[6,4], index: 1, kind: input, shape index: {}]   ;;  %s1161_s2 = inlined_call_operand.vmem [shape: f32[6,4], index: 2, kind: input, shape index: {}]   ;;  %s1162_s3 = inlined_call_operand.vmem [shape: f32[6,1], index: 3, kind: input, shape index: {}]   ;;  %s1163_s4 = inlined_call_operand.vmem [shape: f32[8,6], index: 4, kind: input, shape index: {}]   ;;  %s1164_s5 = inlined_call_operand.vmem [shape: f32[8,6], index: 5, kind: input, shape index: {}]   ;;  %s1165_s6 = inlined_call_operand.vmem [shape: f32[8,1], index: 6, kind: input, shape index: {}]   ;;  %s1166_s7 = inlined_call_operand.hbm [shape: f32[2,8,16], index: 7, kind: output, shape index: {}]  }
   0x1   :  { %14 = vsyncpa [#allocation3 + $0x1], 0  ;;  %s982_s24 = smov 0   ;;  %s984_s25 = smov 0  }
   0x2   :  { %s986_s26 = smov 0   ;;  %s988_s27 = smov 0  }
   0x3 LB: > { %s1003_s28 = sadd.s32 4294967295, %s938_s27   ;;  %s818_s29 = sadd.s32 4294967294, %s938_s27   ;;  %s938_s27 = sphi %s988_s27, %s1172_s27   ;;  %s934_s26 = sphi %s986_s26, %s1171_s26   ;;  %s930_s25 = sphi %s984_s25, %s1170_s25   ;;  %s926_s24 = sphi %s982_s24, %s1169_s24  }
   0x4   : > { %s1007_s30 = sadd.s32 1, %s938_s27   ;;  %s179_s8 = sadd.s32 1, %s934_s26 }
   0x5   : > { %s176_s9 = ssub.s32 %s938_s27, %s1007_s30  ;;  %p189_p0 = scmp.ne.s32.totalorder %s934_s26, %s930_s25 }
   0x6   : > { %p177_p1 = scmp.eq.s32.totalorder %s176_s9, 0  ;;  %p190_p2 = scmp.eq.s32.totalorder %s1003_s28, 1 }
   0x7   : > { %p195_p3 = scmp.ne.s32.totalorder %s930_s25, %s926_s24  ;;  %p196_p4 = scmp.eq.s32.totalorder %s818_s29, 1 }
   0x8   : > { %s1018_s10 = scalar_select %p177_p1, %s934_s26, %s179_s8  }
   0x9   : > { %p1020_p5 = por %p190_p2, %p189_p0  ;;  %p1024_p6 = por %p196_p4, %p195_p3 }
   0xa   : > { %p821_p7 = scmp.ge.s32.totalorder %s938_s27, 1  ;;  %p239_p8 = scmp.lt.s32.totalorder %s938_s27, 3 }
   0xc   : > { %p240_p9 = pnand %p821_p7, %p239_p8 }
   0xd   : > { %p270_p10 = scmp.lt.s32.totalorder (!%p240_p9), %s1003_s28, 1  ;;  %s941_s22 = smov (!%p240_p9), 127  }
   0xe   : > { %243 = sbr.rel (%p240_p9) target bundleno = 434 (0x1b2), region = 48  ;;  %s825_s19 = sshll.u32 (!%p240_p9), %s1003_s28, 3 }
   0xf   : > { %s896_s16 = scalar_lea.hbm (!%p240_p9), %s1166_s7, 16 }
  0x13   : > { %v278_v0 = vlaneseq  ;;  %v275_v2 = vld [vmem:[%s1160_s1] sm:$0x3f]  ;;  %s271_s17 = scalar_select %p270_p10, %s1003_s28, 1  ;;  %v940_v16 = vmov 0   ;;  %vm403_vm0 = vcmask 134144   ;;  %vm533_vm1 = vcmask 1041409  }
  0x14   : > { %v305_v3 = vperm.slane %v275_v2, 4  ;;  %v291_v4 = vperm.slane %v275_v2, 2  ;;  %v277_v5 = vperm.slane %v275_v2, 0  ;;  %v276_v6 = vld [vmem:[%s1161_s2] sm:$0x3f]  ;;  %v298_v8 = vperm.slane %v275_v2, 3 }
  0x15   : > { %v279_v1 = vshrl.u32 %v278_v0, 7  ;;  %v332_v7 = vperm.slane %v276_v6, 1  ;;  %v284_v9 = vperm.slane %v275_v2, 1  ;;  %v346_v10 = vperm.slane %v276_v6, 3  ;;  %s823_s18 = sshll.u32 %s271_s17, 2  ;;  %v468_v33 = vld [vmem:[%s1163_s4] sm:$0xff] }
  0x16   : > { %v325_v11 = vperm.slane %v276_v6, 0  ;;  %v339_v12 = vperm.slane %v276_v6, 2  ;;  %v360_v13 = vperm.slane %v276_v6, 5  ;;  %v312_v14 = vperm.slane %v275_v2, 5  ;;  %s273_s21 = scalar_lea.vmem %s1159_s0, %s823_s18  ;;  %v446_v25 = vld [vmem:[%s1162_s3] sm:$0x3f] }
  0x17   : > { %871 = vset.pattern.permute.xlu2 %v279_v1  ;;  %870 = vset.pattern.permute.xlu1 %v279_v1  ;;  %v353_v15 = vperm.slane %v276_v6, 4  ;;  %v1042_v18 = vld [vmem:[%s273_s21] sm:$0xf]  ;;  %v498_v34 = vperm.slane %v468_v33, 4  ;;  %v477_v45 = vperm.slane %v468_v33, 1  ;;  %v470_v47 = vperm.slane %v468_v33, 0 }
  0x18   : > { %869 = vset.pattern.permute.xlu0 %v279_v1  ;;  %v1072_v39 = vld [vmem:[%s1164_s5] sm:$0xff]  ;;  %v491_v48 = vperm.slane %v468_v33, 3  ;;  %v519_v49 = vperm.slane %v468_v33, 7  ;;  %v484_v50 = vperm.slane %v468_v33, 2  ;;  %v512_v51 = vperm.slane %v468_v33, 6  ;;  %s267_s17 = sand.u32 1, %s930_s25  }
  0x19   : > { %v570_v40 = vperm.slane %v1072_v39, 2  ;;  %v584_v46 = vperm.slane %v1072_v39, 4  ;;  %v505_v52 = vperm.slane %v468_v33, 5  ;;  %v577_v53 = vperm.slane %v1072_v39, 3  ;;  %s1118_s18 = sshll.u32 %s267_s17, 3  ;;  %s744_s8 = scalar_lea.sflag [#allocation3], %s267_s17 }
  0x1a   : > { %v563_v54 = vperm.slane %v1072_v39, 1  ;;  %v556_v55 = vperm.slane %v1072_v39, 0  ;;  %v591_v56 = vperm.slane %v1072_v39, 5  ;;  %v605_v57 = vperm.slane %v1072_v39, 7  ;;  %s269_s28 = scalar_lea.vmem [#allocation2], %s1118_s18 }
  0x1b   : > { %vm536_vm2 = vcmask 1042434   ;;  %vm539_vm3 = vcmask 1043459   ;;  %vm542_vm4 = vcmask 1044484   ;;  %vm545_vm5 = vcmask 1045509   ;;  %s756_s23 = sshll.u32 %s269_s28, 4  ;;  %s757_s23 = int_to_ptr.vmem [resolvable:$true] %s756_s23 }
  0x1c   : > { %vm631_vm6 = vcmask 128000   ;;  %vm735_vm7 = vcmask 1046534   ;;  %vm738_vm8 = vcmask 1047559   ;;  %vm741_vm9 = vcmask 130048  }
  0x1f   : > { %310 = vperm.xlu2 %871, %v305_v3   ;;  %296 = vperm.xlu1 %870, %v291_v4  }
  0x20   : > { %282 = vperm.xlu0 %869, %v277_v5  }
  0x27   : > { %337 = vperm.xlu2 %871, %v332_v7   ;;  %303 = vperm.xlu1 %870, %v298_v8  }
  0x28   : > { %289 = vperm.xlu0 %869, %v284_v9  }
  0x2f   : > { %351 = vperm.xlu2 %871, %v346_v10   ;;  %330 = vperm.xlu1 %870, %v325_v11  }
  0x30   : > { %344 = vperm.xlu0 %869, %v339_v12  }
  0x37   : > { %365 = vperm.xlu1 %870, %v360_v13   ;;  %317 = vperm.xlu2 %871, %v312_v14  }
  0x38   : > { %358 = vperm.xlu0 %869, %v353_v15  }
  0x40   : > { %872 = vset.pattern.permute.xlu0 %v940_v16 }
  0x79   : > { %v311_v17 = vpop.permute.xlu2 %310 }
  0x7a   : > { %v1045_v19 = vmul.f32 %v311_v17, %v1042_v18 }
  0x81   : > { %v338_v20 = vpop.permute.xlu2 %337 }
  0x82   : > { %v368_v21 = vmul.f32 %v338_v20, %v1042_v18 }
  0x84   : > { %381 = vrot.lane.b32.xlu0 %v368_v21, %s941_s22 }
  0x89   : > { %v352_v22 = vpop.permute.xlu2 %351 }
  0x8a   : > { %v370_v23 = vmul.f32 %v352_v22, %v1042_v18 }
  0x8c   : > { %385 = vrot.lane.b32.xlu0 %v370_v23, %s941_s22 }
  0x91   : > { %v297_v24 = vpop.permute.xlu1 %296  ;;  %v318_v58 = vpop.permute.xlu2 %317 }
  0x92   : > { %v1055_v26 = vmul.f32 %v297_v24, %v1042_v18  ;;  %v283_v27 = vpop.permute.xlu0 %282  ;;  %v324_v23 = vmul.f32 %v318_v58, %v1042_v18 }
  0x93   : > { %v319_v28 = vmul.f32 %v283_v27, %v1042_v18 }
  0x94   : > { %449 = vperm.xlu0 %872, %v446_v25  }
  0x99   : > { %v304_v29 = vpop.permute.xlu1 %303 }
  0x9a   : > { %v1059_v30 = vmul.f32 %v304_v29, %v1042_v18  ;;  %v290_v31 = vpop.permute.xlu0 %289 }
  0x9b   : > { %v320_v32 = vmul.f32 %v290_v31, %v1042_v18 }
  0x9c   : > { %873 = vset.pattern.permute.xlu0 %v279_v1 }
  0xa1   : > { %v331_v35 = vpop.permute.xlu1 %330 }
  0xa2   : > { %v367_v36 = vmul.f32 %v331_v35, %v1042_v18  ;;  %v345_v37 = vpop.permute.xlu0 %344 }
  0xa3   : > { %v369_v38 = vmul.f32 %v345_v37, %v1042_v18 }
  0xa4   : > { %379 = vrot.lane.b32.xlu2 %v367_v36, %s941_s22  ;;  %503 = vperm.xlu0 %873, %v498_v34  }
  0xa5   : > { %383 = vrot.lane.b32.xlu1 %v369_v38, %s941_s22 }
  0xa9   : > { %v366_v41 = vpop.permute.xlu1 %365 }
  0xaa   : > { %v372_v42 = vmul.f32 %v366_v41, %v1042_v18  ;;  %v359_v43 = vpop.permute.xlu0 %358 }
  0xab   : > { %v371_v44 = vmul.f32 %v359_v43, %v1042_v18 }
  0xac   : > { %389 = vrot.lane.b32.xlu2 %v372_v42, %s941_s22  ;;  %575 = vperm.xlu0 %873, %v570_v40  }
  0xad   : > { %387 = vrot.lane.b32.xlu1 %v371_v44, %s941_s22 }
  0xb4   : > { %482 = vperm.xlu2 %871, %v477_v45   ;;  %589 = vperm.xlu0 %873, %v584_v46  }
  0xb5   : > { %475 = vperm.xlu1 %870, %v470_v47  }
  0xbc   : > { %496 = vperm.xlu2 %871, %v491_v48   ;;  %524 = vperm.xlu0 %873, %v519_v49  }
  0xbd   : > { %489 = vperm.xlu1 %870, %v484_v50  }
  0xc4   : > { %517 = vperm.xlu2 %871, %v512_v51   ;;  %875 = vset.pattern.permute.xlu0 %v940_v16 }
  0xc5   : > { %510 = vperm.xlu1 %870, %v505_v52  }
  0xcc   : > { %582 = vperm.xlu2 %871, %v577_v53  }
  0xcd   : > { %568 = vperm.xlu1 %870, %v563_v54  }
  0xd5   : > { %561 = vperm.xlu1 %870, %v556_v55  }
  0xdd   : > { %596 = vperm.xlu1 %870, %v591_v56  }
  0xe5   : > { %610 = vperm.xlu1 %870, %v605_v57  }
  0xf6   : > { %v382_v59 = vpop.permute.xlu0 %381 }
  0xf7   : > { %v398_v60 = vadd.f32 %v382_v59, %v320_v32 }
  0xf9   : > { %v411_v61 = vsel %vm403_vm0, %v398_v60, 0.0 }
  0xfa   : > { %v412_v62 = vrot.slane %v411_v61, 4 }
  0xfc   : > { %v413_v63 = vadd.f32 %v412_v62, %v411_v61 }
  0xfe   : > { %v414_v0 = vrot.slane %v413_v63, 2  ;;  %v386_v1 = vpop.permute.xlu0 %385  ;;  %v380_v2 = vpop.permute.xlu2 %379 }
  0xff   : > { %v397_v3 = vadd.f32 %v380_v2, %v319_v28  ;;  %v400_v11 = vadd.f32 %v386_v1, %v1059_v30 }
 0x100   : > { %v415_v4 = vadd.f32 %v414_v0, %v413_v63 }
 0x101   : > { %v404_v5 = vsel %vm403_vm0, %v397_v3, 0.0  ;;  %v425_v20 = vsel %vm403_vm0, %v400_v11, 0.0  ;;  %v598_v11 = vperm.slane %v1072_v39, 6 }
 0x102   : > { %v405_v6 = vrot.slane %v404_v5, 4  ;;  %v416_v7 = vrot.slane %v415_v4, 1  ;;  %v426_v24 = vrot.slane %v425_v20, 4 }
 0x104   : > { %v406_v8 = vadd.f32 %v405_v6, %v404_v5  ;;  %v417_v13 = vadd.f32 %v416_v7, %v415_v4  ;;  %v427_v31 = vadd.f32 %v426_v24, %v425_v20 }
 0x106   : > { %v407_v9 = vrot.slane %v406_v8, 2  ;;  %v450_v10 = vpop.permute.xlu0 %449  ;;  %v390_v22 = vpop.permute.xlu2 %389  ;;  %v428_v32 = vrot.slane %v427_v31, 2 }
 0x107   : > { %v451_v12 = vrot.slane %v450_v10, 1  ;;  %v402_v28 = vadd.f32 %v390_v22, %v324_v23  ;;  %v453_v48 = vrot.slane %v450_v10, 3  ;;  %v455_v61 = vrot.slane %v450_v10, 5 }
 0x108   : > { %v408_v14 = vadd.f32 %v407_v9, %v406_v8  ;;  %v429_v36 = vadd.f32 %v428_v32, %v427_v31  ;;  %v454_v3 = vrot.slane %v450_v10, 4 }
 0x109   : > { %v463_v17 = vadd.f32 %v451_v12, %v417_v13  ;;  %v439_v30 = vsel %vm403_vm0, %v402_v28, 0.0  ;;  %v688_v12 = vld [vmem:[%s1165_s6] sm:$0xff] }
 0x10a   : > { %v409_v15 = vrot.slane %v408_v14, 1  ;;  %v440_v33 = vrot.slane %v439_v30, 4  ;;  %v430_v41 = vrot.slane %v429_v36, 1 }
 0x10b   : > { %v532_v27 = vrot.slane %v463_v17, 7 }
 0x10c   : > { %v410_v21 = vadd.f32 %v409_v15, %v408_v14  ;;  %v441_v37 = vadd.f32 %v440_v33, %v439_v30  ;;  %v431_v47 = vadd.f32 %v430_v41, %v429_v36 }
 0x10e   : > { %v462_v25 = vadd.f32 %v450_v10, %v410_v21  ;;  %v442_v42 = vrot.slane %v441_v37, 2  ;;  %v465_v55 = vadd.f32 %v453_v48, %v431_v47  ;;  %v483_v15 = vpop.permute.xlu2 %482 }
 0x110   : > { %v534_v29 = vsel %vm533_vm1, %v532_v27, %v462_v25  ;;  %v443_v49 = vadd.f32 %v442_v42, %v441_v37 }
 0x112   : > { %v444_v56 = vrot.slane %v443_v49, 1 }
 0x114   : > { %v445_v62 = vadd.f32 %v444_v56, %v443_v49 }
 0x116   : > { %v467_v4 = vadd.f32 %v455_v61, %v445_v62  ;;  %v504_v17 = vpop.permute.xlu0 %503  ;;  %v497_v21 = vpop.permute.xlu2 %496 }
 0x117   : > { %v384_v34 = vpop.permute.xlu1 %383 }
 0x118   : > { %v399_v35 = vadd.f32 %v384_v34, %v1055_v26  ;;  %v452_v26 = vrot.slane %v450_v10, 2  ;;  %v544_v7 = vrot.slane %v467_v4, 3 }
 0x11a   : > { %v418_v38 = vsel %vm403_vm0, %v399_v35, 0.0 }
 0x11b   : > { %v419_v18 = vrot.slane %v418_v38, 4 }
 0x11d   : > { %v420_v40 = vadd.f32 %v419_v18, %v418_v38 }
 0x11e   : > { %v576_v22 = vpop.permute.xlu0 %575  ;;  %v518_v24 = vpop.permute.xlu2 %517 }
 0x11f   : > { %v421_v43 = vrot.slane %v420_v40, 2  ;;  %v388_v44 = vpop.permute.xlu1 %387 }
 0x120   : > { %v401_v45 = vadd.f32 %v388_v44, %v1045_v19  ;;  %v538_v19 = vrot.slane %v465_v55, 5 }
 0x121   : > { %v422_v46 = vadd.f32 %v421_v43, %v420_v40 }
 0x122   : > { %v432_v50 = vsel %vm403_vm0, %v401_v45, 0.0 }
 0x123   : > { %v423_v51 = vrot.slane %v422_v46, 1  ;;  %v433_v52 = vrot.slane %v432_v50, 4 }
 0x125   : > { %v424_v53 = vadd.f32 %v423_v51, %v422_v46  ;;  %v434_v54 = vadd.f32 %v433_v52, %v432_v50 }
 0x126   : > { %v590_v25 = vpop.permute.xlu0 %589  ;;  %v583_v27 = vpop.permute.xlu2 %582 }
 0x127   : > { %v464_v57 = vadd.f32 %v452_v26, %v424_v53  ;;  %v435_v58 = vrot.slane %v434_v54, 2  ;;  %v476_v10 = vpop.permute.xlu1 %475 }
 0x129   : > { %v535_v59 = vrot.slane %v464_v57, 6  ;;  %v436_v60 = vadd.f32 %v435_v58, %v434_v54 }
 0x12b   : > { %v537_v63 = vsel %vm536_vm2, %v535_v59, %v534_v29  ;;  %v437_v0 = vrot.slane %v436_v60, 1 }
 0x12c   : > { %v540_v1 = vsel %vm539_vm3, %v538_v19, %v537_v63 }
 0x12d   : > { %v438_v2 = vadd.f32 %v437_v0, %v436_v60 }
 0x12e   : > { %v525_v28 = vpop.permute.xlu0 %524 }
 0x12f   : > { %v466_v5 = vadd.f32 %v454_v3, %v438_v2  ;;  %v490_v13 = vpop.permute.xlu1 %489 }
 0x131   : > { %v541_v6 = vrot.slane %v466_v5, 4 }
 0x133   : > { %v543_v8 = vsel %vm542_vm4, %v541_v6, %v540_v1 }
 0x134   : > { %v546_v9 = vsel %vm545_vm5, %v544_v7, %v543_v8 }
 0x135   : > { %612 = vrot.lane.b32.xlu2 %v546_v9, %s941_s22  ;;  %v548_v29 = vmul.f32 %v546_v9, %v476_v10  ;;  %v550_v31 = vmul.f32 %v546_v9, %v490_v13  ;;  %v555_v30 = vmul.f32 %v546_v9, %v525_v28  ;;  %v549_v33 = vmul.f32 %v546_v9, %v483_v15  ;;  %s754_s22 = scalar_lea.hbm %s1166_s7, %s825_s19 }
 0x136   : > { %v551_v34 = vmul.f32 %v546_v9, %v497_v21  ;;  %v552_v35 = vmul.f32 %v546_v9, %v504_v17  ;;  %v554_v58 = vmul.f32 %v546_v9, %v518_v24  ;;  %s758_s29 = sshll.u32 %s754_s22, 4  ;;  %s759_s29 = int_to_ptr.hbm [resolvable:$true] %s758_s29 }
 0x137   : > { %v511_v14 = vpop.permute.xlu1 %510  ;;  %s890_s9 = sshra.s32 %s759_s29, 4  ;;  %s891_s9 = int_to_ptr.hbm [resolvable:$true] %s890_s9 }
 0x138   : > { %v553_v32 = vmul.f32 %v546_v9, %v511_v14  ;;  %s892_s13 = scalar_lea.hbm %s891_s9, 8  ;;  %p897_p0 = scmp.lt.s32.totalorder %s891_s9, %s1166_s7 }
 0x139   : > { %p893_p11 = scmp.ne.s32.totalorder %s891_s9, %s892_s13  ;;  %p898_p1 = scmp.lt.s32.totalorder %s896_s16, %s892_s13 }
 0x13b   : > { %p894_p12 = pnand %p893_p11, %p1020_p5  ;;  %p899_p2 = por %p898_p1, %p897_p0 }
 0x13d   : > { %603 = vperm.xlu2 %871, %v598_v11   ;;  %p895_p13 = pneg %p894_p12 }
 0x13f   : > { %v569_v20 = vpop.permute.xlu1 %568  ;;  %p900_p3 = pnand %p899_p2, %p895_p13 }
 0x145   : > { %874 = vset.pattern.permute.xlu2 %v940_v16 }
 0x146   : > { %691 = vperm.xlu2 %874, %v688_v12  }
 0x147   : > { %v562_v23 = vpop.permute.xlu1 %561 }
 0x14f   : > { %v597_v39 = vpop.permute.xlu1 %596 }
 0x157   : > { %v611_v36 = vpop.permute.xlu1 %610 }
 0x18f   : > { %v613_v16 = vpop.permute.xlu2 %612 }
 0x190   : > { %v615_v37 = vmul.f32 %v613_v16, %v562_v23  ;;  %v616_v38 = vmul.f32 %v613_v16, %v569_v20  ;;  %v617_v18 = vmul.f32 %v613_v16, %v576_v22  ;;  %v618_v40 = vmul.f32 %v613_v16, %v583_v27 }
 0x191   : > { %v619_v41 = vmul.f32 %v613_v16, %v590_v25  ;;  %v620_v42 = vmul.f32 %v613_v16, %v597_v39  ;;  %v622_v43 = vmul.f32 %v613_v16, %v611_v36 }
 0x192   : > { %v623_v44 = vadd.f32 %v615_v37, %v548_v29  ;;  %v624_v45 = vadd.f32 %v616_v38, %v549_v33  ;;  %v625_v46 = vadd.f32 %v617_v18, %v550_v31  ;;  %v626_v47 = vadd.f32 %v618_v40, %v551_v34 }
 0x193   : > { %v627_v48 = vadd.f32 %v619_v41, %v552_v35  ;;  %v628_v49 = vadd.f32 %v620_v42, %v553_v32  ;;  %v630_v50 = vadd.f32 %v622_v43, %v555_v30 }
 0x194   : > { %v632_v51 = vsel %vm631_vm6, %v623_v44, 0.0  ;;  %v639_v26 = vsel %vm631_vm6, %v624_v45, 0.0  ;;  %v646_v52 = vsel %vm631_vm6, %v625_v46, 0.0  ;;  %v653_v53 = vsel %vm631_vm6, %v626_v47, 0.0 }
 0x195   : > { %v633_v54 = vrot.slane %v632_v51, 4  ;;  %v640_v55 = vrot.slane %v639_v26, 4  ;;  %v647_v56 = vrot.slane %v646_v52, 4  ;;  %v654_v57 = vrot.slane %v653_v53, 4 }
 0x196   : > { %v660_v59 = vsel %vm631_vm6, %v627_v48, 0.0  ;;  %v667_v60 = vsel %vm631_vm6, %v628_v49, 0.0  ;;  %v681_v19 = vsel %vm631_vm6, %v630_v50, 0.0 }
 0x197   : > { %v604_v61 = vpop.permute.xlu2 %603  ;;  %v634_v62 = vadd.f32 %v633_v54, %v632_v51  ;;  %v641_v63 = vadd.f32 %v640_v55, %v639_v26  ;;  %v648_v0 = vadd.f32 %v647_v56, %v646_v52  ;;  %v655_v1 = vadd.f32 %v654_v57, %v653_v53 }
 0x198   : > { %v621_v2 = vmul.f32 %v613_v16, %v604_v61  ;;  %v661_v3 = vrot.slane %v660_v59, 4  ;;  %v668_v4 = vrot.slane %v667_v60, 4  ;;  %v682_v5 = vrot.slane %v681_v19, 4 }
 0x199   : > { %v635_v6 = vrot.slane %v634_v62, 2  ;;  %v642_v7 = vrot.slane %v641_v63, 2  ;;  %v649_v8 = vrot.slane %v648_v0, 2  ;;  %v656_v11 = vrot.slane %v655_v1, 2 }
 0x19a   : > { %v629_v9 = vadd.f32 %v621_v2, %v554_v58  ;;  %v662_v12 = vadd.f32 %v661_v3, %v660_v59  ;;  %v669_v10 = vadd.f32 %v668_v4, %v667_v60  ;;  %v683_v13 = vadd.f32 %v682_v5, %v681_v19 }
 0x19b   : > { %v636_v14 = vadd.f32 %v635_v6, %v634_v62  ;;  %v643_v15 = vadd.f32 %v642_v7, %v641_v63  ;;  %v650_v17 = vadd.f32 %v649_v8, %v648_v0  ;;  %v657_v20 = vadd.f32 %v656_v11, %v655_v1 }
 0x19c   : > { %v674_v21 = vsel %vm631_vm6, %v629_v9, 0.0  ;;  %v663_v22 = vrot.slane %v662_v12, 2  ;;  %v670_v23 = vrot.slane %v669_v10, 2  ;;  %v684_v24 = vrot.slane %v683_v13, 2 }
 0x19d   : > { %v675_v25 = vrot.slane %v674_v21, 4  ;;  %v637_v39 = vrot.slane %v636_v14, 1  ;;  %v644_v27 = vrot.slane %v643_v15, 1  ;;  %v651_v28 = vrot.slane %v650_v17, 1 }
 0x19e   : > { %v658_v29 = vrot.slane %v657_v20, 1  ;;  %v664_v31 = vadd.f32 %v663_v22, %v662_v12  ;;  %v671_v30 = vadd.f32 %v670_v23, %v669_v10  ;;  %v685_v32 = vadd.f32 %v684_v24, %v683_v13 }
 0x19f   : > { %v676_v16 = vadd.f32 %v675_v25, %v674_v21  ;;  %v638_v33 = vadd.f32 %v637_v39, %v636_v14  ;;  %v645_v34 = vadd.f32 %v644_v27, %v643_v15  ;;  %v652_v36 = vadd.f32 %v651_v28, %v650_v17 }
 0x1a0   : > { %v692_v35 = vpop.permute.xlu2 %691  ;;  %v659_v37 = vadd.f32 %v658_v29, %v657_v20  ;;  %v665_v38 = vrot.slane %v664_v31, 1  ;;  %v672_v18 = vrot.slane %v671_v30, 1  ;;  %v686_v46 = vrot.slane %v685_v32, 1 }
 0x1a1   : > { %v677_v40 = vrot.slane %v676_v16, 2  ;;  %v693_v41 = vrot.slane %v692_v35, 1  ;;  %v694_v42 = vrot.slane %v692_v35, 2  ;;  %v695_v43 = vrot.slane %v692_v35, 3 }
 0x1a2   : > { %v696_v44 = vrot.slane %v692_v35, 4  ;;  %v697_v45 = vrot.slane %v692_v35, 5  ;;  %v666_v51 = vadd.f32 %v665_v38, %v664_v31  ;;  %v673_v26 = vadd.f32 %v672_v18, %v671_v30 }
 0x1a3   : > { %v678_v47 = vadd.f32 %v677_v40, %v676_v16  ;;  %v709_v48 = vadd.f32 %v693_v41, %v645_v34  ;;  %v710_v49 = vadd.f32 %v694_v42, %v652_v36  ;;  %v711_v50 = vadd.f32 %v695_v43, %v659_v37 }
 0x1a4   : > { %v699_v52 = vrot.slane %v692_v35, 7  ;;  %v708_v54 = vadd.f32 %v692_v35, %v638_v33  ;;  %v687_v57 = vadd.f32 %v686_v46, %v685_v32  ;;  %v712_v58 = vadd.f32 %v696_v44, %v666_v51 }
 0x1a5   : > { %v679_v53 = vrot.slane %v678_v47, 1  ;;  %v724_v55 = vrot.slane %v709_v48, 7  ;;  %v726_v56 = vrot.slane %v710_v49, 6  ;;  %v713_v59 = vadd.f32 %v697_v45, %v673_v26 }
 0x1a6   : > { %v728_v19 = vrot.slane %v711_v50, 5  ;;  %v698_v61 = vrot.slane %v692_v35, 6  ;;  %v715_v63 = vadd.f32 %v699_v52, %v687_v57  ;;  %v730_v1 = vrot.slane %v712_v58, 4 }
 0x1a7   : > { %v680_v60 = vadd.f32 %v679_v53, %v678_v47  ;;  %v725_v62 = vsel %vm533_vm1, %v724_v55, %v708_v54  ;;  %v732_v4 = vrot.slane %v713_v59, 3 }
 0x1a8   : > { %v727_v0 = vsel %vm536_vm2, %v726_v56, %v725_v62  ;;  %v737_v8 = vrot.slane %v715_v63, 1 }
 0x1a9   : > { %v714_v2 = vadd.f32 %v698_v61, %v680_v60  ;;  %v729_v3 = vsel %vm539_vm3, %v728_v19, %v727_v0 }
 0x1aa   : > { %v731_v5 = vsel %vm542_vm4, %v730_v1, %v729_v3 }
 0x1ab   : > { %v733_v6 = vsel %vm545_vm5, %v732_v4, %v731_v5  ;;  %v734_v7 = vrot.slane %v714_v2, 2 }
 0x1ad   : > { %v736_v11 = vsel %vm735_vm7, %v734_v7, %v733_v6 }
 0x1ae   : > { %v739_v9 = vsel %vm738_vm8, %v737_v8, %v736_v11 }
 0x1af   : > { %742 = vst.msk [vmem:[%s269_s28] sm:$0xff] %vm741_vm9, %v739_v9 }
 0x1b0   : > { %903 = shalt.err (!%p900_p3)
}
 0x1b1   : > { %828 = dma.vmem_to_hbm [thread:$0]  (%p1020_p5), %s757_s23, 128, %s759_s29, %s744_s8  }
 0x1b2 PF: > { %p834_p4 = scmp.ge.s32.totalorder %s938_s27, 2  ;;  %s770_s17 = sand.u32 1, %s926_s24  }
 0x1b3   : > { %s771_s20 = scalar_lea.sflag [#allocation3], %s770_s17 }
 0x1b4   : > { %p831_p7 = pnand %p834_p4, %p1024_p6 }
 0x1b6   : > { %p832_p8 = pneg %p831_p7 }
 0x1b8   : > { %921 = dma.done.wait (%p832_p8), %s771_s20, 128  }
 0x1b9   : > { %923 = vsyncadd (%p832_p8), %s771_s20, 4294967168  ;;  %p17_p9 = scmp.ge.s32.totalorder %s1007_s30, 4   ;;  %s1169_s24 = smov %s930_s25 }
 0x1ba   : > { %s1170_s25 = smov %s934_s26  ;;  %s1171_s26 = smov %s1018_s10 }
 0x1bb   : > { %s1172_s27 = smov %s1007_s30  ;;  %19 = sbr.rel (!%p17_p9) target bundleno = 3 (0x3), region = 83 }
 0x1c0   :  { %777 = vsyncpa [#allocation3], 1 }
 0x1c1   :  { %779 = vsyncpa [#allocation3 + $0x1], 1 }

</bundles_post_ra>
